<compile_context>
chip_gen: v6e
topology: v6e:2x2x1
jax: 0.10.0
libtpu: 0.0.40
codegen_flags: <defaults>
</compile_context>

<pallas_src>
import functools

import jax
import jax.numpy as jnp
from jax.experimental import pallas as pl
from jax.experimental.pallas import tpu as pltpu


def _fcn_kernel(x_ref, w1_ref, w34_ref, w2_ref, b_ref, out_ref, *, nhid, nclass):
    # x_ref:   (TM, nfeat)      bf16
    # w1_ref:  (nfeat, nhid)    bf16   pre-transposed fc1 weight (applied x @ W)
    # w34_ref: (2, nhid, nhid)  bf16   fc3 / fc4 weights stacked, pre-transposed
    # w2_ref:  (nhid, P)        bf16   fc2 weight, pre-transposed, lane-padded
    # b_ref:   (4, BW)          f32    rows = b1, b3, b4, b2 (zero-padded)
    # out_ref: (TM, P)          f32    lane-dense padded log_softmax output
    P = out_ref.shape[-1]

    x = x_ref[...]

    # fc1 + relu
    h = jnp.dot(x, w1_ref[...], preferred_element_type=jnp.float32)
    h = h + b_ref[0:1, :nhid]
    h = jnp.maximum(h, 0.0)
    # TODO(synk): F.dropout is identity in eval mode; training-mode stochastic
    #             masking is not implemented.

    # fc3 (no activation in the reference module)
    h = jnp.dot(h.astype(jnp.bfloat16), w34_ref[0],
                preferred_element_type=jnp.float32)
    h = h + b_ref[1:2, :nhid]

    # fc4
    h = jnp.dot(h.astype(jnp.bfloat16), w34_ref[1],
                preferred_element_type=jnp.float32)
    h = h + b_ref[2:3, :nhid]

    # fc2 -> lane-padded logits (TM, P)
    logits = jnp.dot(h.astype(jnp.bfloat16), w2_ref[...],
                     preferred_element_type=jnp.float32)
    logits = logits + b_ref[3:4, :P]

    # log_softmax over dim=1, restricted to the first `nclass` (valid) lanes.
    lane = jax.lax.broadcasted_iota(jnp.int32, logits.shape, 1)
    valid = lane < nclass
    masked = jnp.where(valid, logits, jnp.float32(-1e30))
    m = jnp.max(masked, axis=1, keepdims=True)
    z = masked - m
    p = jnp.where(valid, jnp.exp(z), 0.0)
    lse = jnp.log(jnp.sum(p, axis=1, keepdims=True))
    out_ref[...] = z - lse


def fcn_forward(x, adj, params, *, block_m=128):
    """FCN forward. `adj` is accepted for API parity with the module, unused."""
    del adj  # FCN.forward ignores adj
    N, nfeat = x.shape
    nhid = params["w1"].shape[0]
    nclass = params["w2"].shape[0]

    # Lane-pad the class dim so the final store is lane-dense (multiple of 128).
    P = 128 * pl.cdiv(nclass, 128)
    BW = max(nhid, P)

    # Row-block tiling over the node axis; weights/biases stay whole-array.
    tm = block_m if (N % block_m == 0) else N
    grid = (N // tm,)

    # bf16 matmul operands, weights pre-transposed to (in, out).
    x_bf = x.astype(jnp.bfloat16)
    w1 = params["w1"].T.astype(jnp.bfloat16)                                # (nfeat, nhid)
    w34 = jnp.stack([params["w3"].T, params["w4"].T]).astype(jnp.bfloat16)  # (2, nhid, nhid)
    w2 = jnp.pad(params["w2"].T,
                 ((0, 0), (0, P - nclass))).astype(jnp.bfloat16)            # (nhid, P)

    def pad_bias(b):
        return jnp.pad(b.astype(jnp.float32), (0, BW - b.shape[0]))

    b_pack = jnp.stack([pad_bias(params["b1"]), pad_bias(params["b3"]),
                        pad_bias(params["b4"]), pad_bias(params["b2"])])    # (4, BW)

    kernel = functools.partial(_fcn_kernel, nhid=nhid, nclass=nclass)

    out_padded = pl.pallas_call(
        kernel,
        out_shape=jax.ShapeDtypeStruct((N, P), jnp.float32),
        grid=grid,
        in_specs=[
            pl.BlockSpec((tm, nfeat), lambda i: (i, 0)),
            pl.BlockSpec((nfeat, nhid), lambda i: (0, 0)),
            pl.BlockSpec((2, nhid, nhid), lambda i: (0, 0, 0)),
            pl.BlockSpec((nhid, P), lambda i: (0, 0)),
            pl.BlockSpec((4, BW), lambda i: (0, 0)),
        ],
        out_specs=pl.BlockSpec((tm, P), lambda i: (i, 0)),
        compiler_params=pltpu.CompilerParams(
            dimension_semantics=("parallel",)),
    )(x_bf, w1, w34, w2, b_pack)

    return out_padded[:, :nclass]


def init_params(key, nfeat, nhid, nclass):
    ks = jax.random.split(key, 8)
    scale = 0.1

    def u(k, shape):
        return jax.random.uniform(k, shape, jnp.float32, -scale, scale)

    return {
        # nn.Linear weights stored PyTorch-style as (out_features, in_features)
        "w1": u(ks[0], (nhid, nfeat)),  "b1": u(ks[1], (nhid,)),
        "w3": u(ks[2], (nhid, nhid)),   "b3": u(ks[3], (nhid,)),
        "w4": u(ks[4], (nhid, nhid)),   "b4": u(ks[5], (nhid,)),
        "w2": u(ks[6], (nclass, nhid)), "b2": u(ks[7], (nclass,)),
    }


def ref_forward(x, params):
    h = jax.nn.relu(x @ params["w1"].T + params["b1"])
    h = h @ params["w3"].T + params["b3"]
    h = h @ params["w4"].T + params["b4"]
    logits = h @ params["w2"].T + params["b2"]
    return jax.nn.log_softmax(logits, axis=1)


if __name__ == "__main__":
    key = jax.random.PRNGKey(0)
    k_x, k_adj, k_p = jax.random.split(key, 3)

    N, nfeat, nhid, nclass = 256, 32, 32, 8

    x = jax.random.normal(k_x, (N, nfeat), jnp.float32)
    adj = jax.random.normal(k_adj, (N, N), jnp.float32)  # ignored by FCN.forward

    params = init_params(k_p, nfeat, nhid, nclass)

    out = jax.block_until_ready(fcn_forward(x, adj, params))

    assert out.shape == (N, nclass)
    # log_softmax rows should sum (in prob space) to ~1
    assert bool(jnp.all(jnp.abs(jnp.sum(jnp.exp(out), axis=1) - 1.0) < 1e-3))

    # Compare against a pure-JAX f32 reference (loose tol: bf16 matmul inputs).
    ref = ref_forward(x, params)
    assert bool(jnp.max(jnp.abs(out - ref)) < 5e-2)

    print("KERNEL_OK")
</pallas_src>

<mosaic_0001>
module attributes {stable_mosaic.version = 11 : i64} {
  func.func @_fcn_kernel(%arg0: i32, %arg1: memref<128x32xbf16, #tpu.memory_space<vmem>>, %arg2: memref<32x32xbf16, #tpu.memory_space<vmem>>, %arg3: memref<2x32x32xbf16, #tpu.memory_space<vmem>>, %arg4: memref<32x128xbf16, #tpu.memory_space<vmem>>, %arg5: memref<4x128xf32, #tpu.memory_space<vmem>>, %arg6: memref<128x128xf32, #tpu.memory_space<vmem>>) attributes {dimension_semantics = [#tpu.dimension_semantics<parallel>], iteration_bounds = array<i64: 2>, scalar_prefetch = 0 : i64, scratch_operands = 0 : i64, tpu.core_type = #tpu.core_type<tc>, window_params = [{transform_indices = @transform_0, window_bounds = array<i64: 128, 32>}, {pipeline_mode = #tpu.pipeline_mode<synchronous>, transform_indices = @transform_1, window_bounds = array<i64: 32, 32>}, {pipeline_mode = #tpu.pipeline_mode<synchronous>, transform_indices = @transform_2, window_bounds = array<i64: 2, 32, 32>}, {pipeline_mode = #tpu.pipeline_mode<synchronous>, transform_indices = @transform_3, window_bounds = array<i64: 32, 128>}, {pipeline_mode = #tpu.pipeline_mode<synchronous>, transform_indices = @transform_4, window_bounds = array<i64: 4, 128>}, {transform_indices = @transform_5, window_bounds = array<i64: 128, 128>}]} {
    %c0 = arith.constant 0 : index
    %c0_0 = arith.constant 0 : index
    %0 = vector.load %arg1[%c0, %c0_0] : memref<128x32xbf16, #tpu.memory_space<vmem>>, vector<128x32xbf16>
    %c0_1 = arith.constant 0 : index
    %c0_2 = arith.constant 0 : index
    %1 = vector.load %arg2[%c0_1, %c0_2] : memref<32x32xbf16, #tpu.memory_space<vmem>>, vector<32x32xbf16>
    %cst = arith.constant dense<0.000000e+00> : vector<128x32xf32>
    %2 = tpu.matmul %0, %1, %cst {dimension_numbers = #tpu.dot_dimension_numbers<[1], [0], [0], [1], [0, 0, 1, 1], [], []>} : vector<128x32xbf16>, vector<32x32xbf16>, vector<128x32xf32> -> vector<128x32xf32>
    %c0_3 = arith.constant 0 : index
    %c0_4 = arith.constant 0 : index
    %3 = vector.load %arg5[%c0_3, %c0_4] : memref<4x128xf32, #tpu.memory_space<vmem>>, vector<1x32xf32>
    %4 = vector.broadcast %3 : vector<1x32xf32> to vector<128x32xf32>
    %5 = arith.addf %2, %4 : vector<128x32xf32>
    %cst_5 = arith.constant 0.000000e+00 : f32
    %6 = vector.broadcast %cst_5 : f32 to vector<128x32xf32>
    %7 = arith.maximumf %5, %6 : vector<128x32xf32>
    %8 = arith.truncf %7 : vector<128x32xf32> to vector<128x32xbf16>
    %c0_6 = arith.constant 0 : index
    %c0_7 = arith.constant 0 : index
    %c0_8 = arith.constant 0 : index
    %9 = vector.load %arg3[%c0_6, %c0_7, %c0_8] : memref<2x32x32xbf16, #tpu.memory_space<vmem>>, vector<1x32x32xbf16>
    %10 = vector.shape_cast %9 : vector<1x32x32xbf16> to vector<32x32xbf16>
    %cst_9 = arith.constant dense<0.000000e+00> : vector<128x32xf32>
    %11 = tpu.matmul %8, %10, %cst_9 {dimension_numbers = #tpu.dot_dimension_numbers<[1], [0], [0], [1], [0, 0, 1, 1], [], []>} : vector<128x32xbf16>, vector<32x32xbf16>, vector<128x32xf32> -> vector<128x32xf32>
    %c1 = arith.constant 1 : index
    %c0_10 = arith.constant 0 : index
    %12 = vector.load %arg5[%c1, %c0_10] : memref<4x128xf32, #tpu.memory_space<vmem>>, vector<1x32xf32>
    %13 = vector.broadcast %12 : vector<1x32xf32> to vector<128x32xf32>
    %14 = arith.addf %11, %13 : vector<128x32xf32>
    %15 = arith.truncf %14 : vector<128x32xf32> to vector<128x32xbf16>
    %c1_11 = arith.constant 1 : index
    %c0_12 = arith.constant 0 : index
    %c0_13 = arith.constant 0 : index
    %16 = vector.load %arg3[%c1_11, %c0_12, %c0_13] : memref<2x32x32xbf16, #tpu.memory_space<vmem>>, vector<1x32x32xbf16>
    %17 = vector.shape_cast %16 : vector<1x32x32xbf16> to vector<32x32xbf16>
    %cst_14 = arith.constant dense<0.000000e+00> : vector<128x32xf32>
    %18 = tpu.matmul %15, %17, %cst_14 {dimension_numbers = #tpu.dot_dimension_numbers<[1], [0], [0], [1], [0, 0, 1, 1], [], []>} : vector<128x32xbf16>, vector<32x32xbf16>, vector<128x32xf32> -> vector<128x32xf32>
    %c2 = arith.constant 2 : index
    %c0_15 = arith.constant 0 : index
    %19 = vector.load %arg5[%c2, %c0_15] : memref<4x128xf32, #tpu.memory_space<vmem>>, vector<1x32xf32>
    %20 = vector.broadcast %19 : vector<1x32xf32> to vector<128x32xf32>
    %21 = arith.addf %18, %20 : vector<128x32xf32>
    %22 = arith.truncf %21 : vector<128x32xf32> to vector<128x32xbf16>
    %c0_16 = arith.constant 0 : index
    %c0_17 = arith.constant 0 : index
    %23 = vector.load %arg4[%c0_16, %c0_17] : memref<32x128xbf16, #tpu.memory_space<vmem>>, vector<32x128xbf16>
    %cst_18 = arith.constant dense<0.000000e+00> : vector<128x128xf32>
    %24 = tpu.matmul %22, %23, %cst_18 {dimension_numbers = #tpu.dot_dimension_numbers<[1], [0], [0], [1], [0, 0, 1, 1], [], []>} : vector<128x32xbf16>, vector<32x128xbf16>, vector<128x128xf32> -> vector<128x128xf32>
    %c3 = arith.constant 3 : index
    %c0_19 = arith.constant 0 : index
    %25 = vector.load %arg5[%c3, %c0_19] : memref<4x128xf32, #tpu.memory_space<vmem>>, vector<1x128xf32>
    %26 = vector.broadcast %25 : vector<1x128xf32> to vector<128x128xf32>
    %27 = arith.addf %24, %26 : vector<128x128xf32>
    %28 = tpu.iota {dimensions = array<i32: 1>} : vector<128x128xi32>
    %c8_i32 = arith.constant 8 : i32
    %29 = vector.broadcast %c8_i32 : i32 to vector<128x128xi32>
    %30 = arith.cmpi slt, %28, %29 : vector<128x128xi32>
    %cst_20 = arith.constant -1.000000e+30 : f32
    %31 = vector.broadcast %cst_20 : f32 to vector<128x128xf32>
    %32 = arith.select %30, %27, %31 : vector<128x128xi1>, vector<128x128xf32>
    %cst_21 = arith.constant dense<0xFF800000> : vector<128xf32>
    %33 = vector.multi_reduction <maximumf>, %32, %cst_21 [1] : vector<128x128xf32> to vector<128xf32>
    %34 = vector.shape_cast %33 : vector<128xf32> to vector<128x1xf32>
    %35 = vector.broadcast %34 : vector<128x1xf32> to vector<128x128xf32>
    %36 = arith.subf %32, %35 : vector<128x128xf32>
    %37 = math.exp %36 : vector<128x128xf32>
    %cst_22 = arith.constant 0.000000e+00 : f32
    %38 = vector.broadcast %cst_22 : f32 to vector<128x128xf32>
    %39 = arith.select %30, %37, %38 : vector<128x128xi1>, vector<128x128xf32>
    %cst_23 = arith.constant dense<0.000000e+00> : vector<128xf32>
    %40 = vector.multi_reduction <add>, %39, %cst_23 [1] : vector<128x128xf32> to vector<128xf32>
    %41 = vector.shape_cast %40 : vector<128xf32> to vector<128x1xf32>
    %42 = math.log %41 : vector<128x1xf32>
    %43 = vector.broadcast %42 : vector<128x1xf32> to vector<128x128xf32>
    %44 = arith.subf %36, %43 : vector<128x128xf32>
    %c0_24 = arith.constant 0 : index
    %c0_25 = arith.constant 0 : index
    %45 = vector.load %arg6[%c0_24, %c0_25] : memref<128x128xf32, #tpu.memory_space<vmem>>, vector<128x128xf32>
    tpu.vector_store %arg6[%c0_24, %c0_25], %44 {strides = array<i32>} : memref<128x128xf32, #tpu.memory_space<vmem>>, vector<128x128xf32>,
    return
  }
  func.func @transform_0(%arg0: i32) -> (i32, i32) {
    %c0_i32 = arith.constant 0 : i32
    %c0_i32_0 = arith.constant 0 : i32
    return %arg0, %c0_i32 : i32, i32
  }
  func.func @transform_1(%arg0: i32) -> (i32, i32) {
    %c0_i32 = arith.constant 0 : i32
    %c0_i32_0 = arith.constant 0 : i32
    %c0_i32_1 = arith.constant 0 : i32
    return %c0_i32, %c0_i32_0 : i32, i32
  }
  func.func @transform_2(%arg0: i32) -> (i32, i32, i32) {
    %c0_i32 = arith.constant 0 : i32
    %c0_i32_0 = arith.constant 0 : i32
    %c0_i32_1 = arith.constant 0 : i32
    %c0_i32_2 = arith.constant 0 : i32
    return %c0_i32, %c0_i32_0, %c0_i32_1 : i32, i32, i32
  }
  func.func @transform_3(%arg0: i32) -> (i32, i32) {
    %c0_i32 = arith.constant 0 : i32
    %c0_i32_0 = arith.constant 0 : i32
    %c0_i32_1 = arith.constant 0 : i32
    return %c0_i32, %c0_i32_0 : i32, i32
  }
  func.func @transform_4(%arg0: i32) -> (i32, i32) {
    %c0_i32 = arith.constant 0 : i32
    %c0_i32_0 = arith.constant 0 : i32
    %c0_i32_1 = arith.constant 0 : i32
    return %c0_i32, %c0_i32_0 : i32, i32
  }
  func.func @transform_5(%arg0: i32) -> (i32, i32) {
    %c0_i32 = arith.constant 0 : i32
    %c0_i32_0 = arith.constant 0 : i32
    return %arg0, %c0_i32 : i32, i32
  }
}

</mosaic_0001>

<bundles_post_ra>
// kernel: tpu_custom_call.1
= control target key start
LH: loop header
LB: loop body
LE: loop exit
PB: predicated region body
PF: predicated region fallthrough
CT: control target
= control target key end

     0   :  { %10 = vsyncpa [#allocation3], 0  ;;  %s1932_s0 = inlined_call_operand.vmem [shape: bf16[256,32], index: 0, kind: input, shape index: {}]   ;;  %s1933_s1 = inlined_call_operand.vmem [shape: bf16[32,32], index: 1, kind: input, shape index: {}]   ;;  %s1934_s2 = inlined_call_operand.vmem [shape: bf16[2,32,32], index: 2, kind: input, shape index: {}]   ;;  %s1935_s3 = inlined_call_operand.vmem [shape: bf16[32,128], index: 3, kind: input, shape index: {}]   ;;  %s1936_s4 = inlined_call_operand.vmem [shape: f32[4,128], index: 4, kind: input, shape index: {}]   ;;  %s1937_s5 = inlined_call_operand.hbm [shape: f32[256,128], index: 5, kind: output, shape index: {}]  }
   0x1   :  { %12 = vsyncpa [#allocation3 + $0x1], 0  ;;  %s1585_s18 = smov 0   ;;  %s1587_s19 = smov 0  }
   0x2   :  { %s1589_s20 = smov 0   ;;  %s1591_s21 = smov 0  }
   0x3 LB: > { %s1606_s22 = sadd.s32 4294967295, %s1550_s21   ;;  %s1180_s23 = sadd.s32 4294967294, %s1550_s21   ;;  %s1550_s21 = sphi %s1591_s21, %s1943_s21   ;;  %s1546_s20 = sphi %s1589_s20, %s1942_s20   ;;  %s1542_s19 = sphi %s1587_s19, %s1941_s19   ;;  %s1538_s18 = sphi %s1585_s18, %s1940_s18  }
   0x4   : > { %s1610_s24 = sadd.s32 1, %s1550_s21   ;;  %s135_s25 = sadd.s32 1, %s1546_s20 }
   0x5   : > { %s132_s26 = ssub.s32 %s1550_s21, %s1610_s24  ;;  %p145_p0 = scmp.ne.s32.totalorder %s1546_s20, %s1542_s19 }
   0x6   : > { %p133_p1 = scmp.eq.s32.totalorder %s132_s26, 0  ;;  %p146_p2 = scmp.eq.s32.totalorder %s1606_s22, 1 }
   0x7   : > { %p151_p3 = scmp.ne.s32.totalorder %s1542_s19, %s1538_s18  ;;  %p152_p4 = scmp.eq.s32.totalorder %s1180_s23, 1 }
   0x8   : > { %s1621_s27 = scalar_select %p133_p1, %s1546_s20, %s135_s25  }
   0x9   : > { %p1623_p5 = por %p146_p2, %p145_p0  ;;  %p1627_p6 = por %p152_p4, %p151_p3 }
   0xa   : > { %p1183_p7 = scmp.ge.s32.totalorder %s1550_s21, 1  ;;  %p191_p8 = scmp.lt.s32.totalorder %s1550_s21, 3 }
   0xc   : > { %p192_p9 = pnand %p1183_p7, %p191_p8 }
   0xd   : > { %s1185_s7 = sshll.u32 (!%p192_p9), %s1606_s22, 4  ;;  %s216_s23 = sand.u32 (!%p192_p9), 1, %s1542_s19  }
   0xe   : > { %195 = sbr.rel (%p192_p9) target bundleno = 1199 (0x4af), region = 40  ;;  %p220_p10 = scmp.lt.s32.totalorder (!%p192_p9), %s1185_s7, 31 }
   0xf   : > { %s1184_s25 = sshll.u32 (!%p192_p9), %s216_s23, 7  ;;  %s1248_s30 = sshll.u32 (!%p192_p9), %s1606_s22, 11 }
  0x10   : > { %s1848_s26 = scalar_lea.vmem (!%p192_p9), [#allocation2], %s1184_s25  ;;  %s1884_s9 = scalar_lea.hbm (!%p192_p9), %s1937_s5, %s1248_s30 }
  0x11   : > { %s1118_s6 = sshll.u32 (!%p192_p9), %s1848_s26, 4  ;;  %s1892_s22 = scalar_lea.sflag (!%p192_p9), [#allocation3], %s216_s23  ;;  %s1886_s6 = int_to_ptr.vmem [resolvable:$true] %s1118_s6 }
  0x12   : > { %s1552_s11 = smov (!%p192_p9), [#allocation2]  }
  0x13   : > { %v1410_v0 = vld [vmem:[%s1933_s1 + $0x8] sm:$0xff]   ;;  %v1411_v1 = vld [vmem:[%s1933_s1] sm:$0xff]   ;;  %s1945_s7 = smov (!%p220_p10, %s1185_s7), 31  ;;  %vm304_vm0 = vcmask 261120   ;;  %v1422_v12 = vld [vmem:[%s1934_s2 + $0x18] sm:$0xff]   ;;  %s1494_s12 = sshll.u32 %s1552_s11, 4  ;;  %s1495_s12 = int_to_ptr.vmem [resolvable:$false] %s1494_s12 }
  0x14   : > { %1289 = vmatprep.subr.bf16.mxu0 %v1410_v0  ;;  %s1186_s10 = sshll.u32 %s1945_s7, 2  ;;  %v1420_v10 = vld [vmem:[%s1934_s2 + $0x8] sm:$0xff]   ;;  %v1421_v11 = vld [vmem:[%s1934_s2] sm:$0xff]   ;;  %v1423_v13 = vld [vmem:[%s1934_s2 + $0x10] sm:$0xff]   ;;  %p1497_p0 = scmp.lt.s32.totalorder %s1886_s6, %s1495_s12 }
  0x15   : > { %1290 = vmatpush3.bf16.msra.mxu0 %v1410_v0  ;;  %s223_s13 = scalar_lea.vmem %s1932_s0, %s1186_s10  ;;  %1309 = vmatprep.subr.bf16.mxu1 %v1420_v10  ;;  %v1187_v16 = vld [vmem:[%s1936_s4] ss:$0 sm:$0xff]  ;;  %s1490_s10 = scalar_lea.vmem %s1886_s6, 2048 }
  0x16   : > { %1291 = vmatprep.subr.bf16.mxu0 %v1411_v1  ;;  %v1412_v2 = vld [vmem:[%s223_s13] sm:$0xff]   ;;  %v1413_v3 = vld [vmem:[%s223_s13 + $0x8] sm:$0xff]   ;;  %v1414_v4 = vld [vmem:[%s223_s13 + $0x10] sm:$0xff]   ;;  %1310 = vmatpush3.bf16.msra.mxu1 %v1420_v10  ;;  %p1491_p11 = scmp.ne.s32.totalorder %s1886_s6, %s1490_s10 }
  0x17   : > { %1293 = vmatprep.mubr.msk.bf16.mxu0 %vm304_vm0, %v1412_v2  ;;  %v1415_v5 = vld [vmem:[%s223_s13 + $0x18] sm:$0xff]   ;;  %v1416_v6 = vld [vmem:[%s223_s13 + $0x20] sm:$0xff]   ;;  %v1417_v7 = vld [vmem:[%s223_s13 + $0x28] sm:$0xff]   ;;  %1311 = vmatprep.subr.bf16.mxu1 %v1421_v11 }
  0x18   : > { %v1418_v8 = vld [vmem:[%s223_s13 + $0x30] sm:$0xff]   ;;  %v1419_v9 = vld [vmem:[%s223_s13 + $0x38] sm:$0xff]   ;;  %p1492_p12 = pnand %p1491_p11, %p1623_p5  ;;  %s1496_s13 = scalar_lea.vmem %s1495_s12, 4096 }
  0x19   : > { %1292 = vmatpush3.bf16.msra.mxu0 %v1411_v1  ;;  %p1498_p1 = scmp.lt.s32.totalorder %s1496_s13, %s1490_s10 }
  0x1a   : > { %1312 = vmatpush3.bf16.msra.mxu1 %v1421_v11  ;;  %1329 = vmatprep.subr.bf16.mxu0 %v1422_v12  ;;  %p1493_p13 = pneg %p1492_p12 }
  0x1b   : > { %p1499_p2 = por %p1498_p1, %p1497_p0 }
  0x1c   : > { %1294 = vmatmul.mubr.msk.bf16.vlgmr.msra.gmra.mxu0 %vm304_vm0, %v1413_v3 }
  0x1d   : > { %1297 = vmatprep.mubr.msk.bf16.mxu0 %vm304_vm0, %v1414_v4  ;;  %1330 = vmatpush3.bf16.msra.mxu0 %v1422_v12  ;;  %v1206_v12 = vld [vmem:[%s1936_s4 + $0x1] ss:$0 sm:$0xff]  ;;  %p1500_p3 = pnand %p1499_p2, %p1493_p13 }
  0x1e   : > { %1331 = vmatprep.subr.bf16.mxu0 %v1423_v13 }
  0x21   : > { %1332 = vmatpush3.bf16.msra.mxu0 %v1423_v13 }
  0x24   : > { %1298 = vmatmul.mubr.msk.bf16.gmra.mxu0 %vm304_vm0, %v1415_v5 }
  0x25   : > { %1301 = vmatprep.mubr.msk.bf16.mxu0 %vm304_vm0, %v1416_v6 }
  0x2c   : > { %1302 = vmatmul.mubr.msk.bf16.gmra.mxu0 %vm304_vm0, %v1417_v7  ;;  %v1424_v7 = vld [vmem:[%s1935_s3 + $0x8] sm:$0xff]  }
  0x2d   : > { %1305 = vmatprep.mubr.msk.bf16.mxu0 %vm304_vm0, %v1418_v8  ;;  %v1425_v8 = vld [vmem:[%s1935_s3] sm:$0xff]   ;;  %1349 = vmatprep.subr.bf16.mxu1 %v1424_v7 }
  0x34   : > { %1306 = vmatmul.mubr.msk.bf16.gmra.mxu0 %vm304_vm0, %v1419_v9 }
  0xdc   : > { %v1295_v14 = vpop.f32.mrf.mxu0 }
  0xdd   : > { %v372_v20 = vadd.f32 %v1295_v14, %v1187_v16 }
  0xde   : > { %v363_v15 = vpop.f32.mrf.mxu0 }
  0xdf   : > { %v364_v18 = vadd.f32 %v1187_v16, %v363_v15  ;;  %v428_v27 = vmax.f32 %v372_v20, 0.0 }
  0xe0   : > { %v1296_v17 = vpop.f32.mrf.mxu0 }
  0xe1   : > { %v375_v19 = vadd.f32 %v1296_v17, %v1187_v16  ;;  %v426_v25 = vmax.f32 %v364_v18, 0.0 }
  0xe2   : > { %v366_v21 = vpop.f32.mrf.mxu0 }
  0xe3   : > { %v367_v22 = vadd.f32 %v1187_v16, %v366_v21  ;;  %v429_v23 = vmax.f32 %v375_v19, 0.0 }
  0xe4   : > { %v1299_v24 = vpop.f32.mrf.mxu0 }
  0xe5   : > { %v427_v26 = vmax.f32 %v367_v22, 0.0  ;;  %v443_v30 = vpack.c.bf16 %v429_v23, %v428_v27  ;;  %v388_v34 = vadd.f32 %v1299_v24, %v1187_v16 }
  0xe6   : > { %v379_v28 = vpop.f32.mrf.mxu0 }
  0xe7   : > { %v442_v29 = vpack.c.bf16 %v427_v26, %v426_v25  ;;  %v380_v32 = vadd.f32 %v1187_v16, %v379_v28  ;;  %v432_v41 = vmax.f32 %v388_v34, 0.0 }
  0xe8   : > { %v1300_v31 = vpop.f32.mrf.mxu0 }
  0xe9   : > { %v391_v33 = vadd.f32 %v1300_v31, %v1187_v16  ;;  %1313 = vmatprep.mubr.msk.bf16.mxu1 %vm304_vm0, %v442_v29  ;;  %v430_v39 = vmax.f32 %v380_v32, 0.0 }
  0xea   : > { %v382_v35 = vpop.f32.mrf.mxu0  ;;  %1314 = vmatmul.mubr.msk.bf16.vlgmr.msra.gmra.mxu1 %vm304_vm0, %v443_v30 }
  0xeb   : > { %v383_v36 = vadd.f32 %v1187_v16, %v382_v35  ;;  %v433_v37 = vmax.f32 %v391_v33, 0.0  ;;  %1350 = vmatpush3.bf16.msra.mxu1 %v1424_v7 }
  0xec   : > { %v1303_v38 = vpop.f32.mrf.mxu0  ;;  %1351 = vmatprep.subr.bf16.mxu1 %v1425_v8 }
  0xed   : > { %v431_v40 = vmax.f32 %v383_v36, 0.0  ;;  %v445_v44 = vpack.c.bf16 %v433_v37, %v432_v41  ;;  %v404_v48 = vadd.f32 %v1303_v38, %v1187_v16 }
  0xee   : > { %v395_v42 = vpop.f32.mrf.mxu0 }
  0xef   : > { %v444_v43 = vpack.c.bf16 %v431_v40, %v430_v39  ;;  %v396_v46 = vadd.f32 %v1187_v16, %v395_v42  ;;  %v436_v55 = vmax.f32 %v404_v48, 0.0  ;;  %1352 = vmatpush3.bf16.msra.mxu1 %v1425_v8 }
  0xf0   : > { %v1304_v45 = vpop.f32.mrf.mxu0 }
  0xf1   : > { %v407_v47 = vadd.f32 %v1304_v45, %v1187_v16  ;;  %1317 = vmatprep.mubr.msk.bf16.mxu1 %vm304_vm0, %v444_v43  ;;  %v434_v53 = vmax.f32 %v396_v46, 0.0 }
  0xf2   : > { %v398_v49 = vpop.f32.mrf.mxu0  ;;  %1318 = vmatmul.mubr.msk.bf16.gmra.mxu1 %vm304_vm0, %v445_v44 }
  0xf3   : > { %v399_v50 = vadd.f32 %v1187_v16, %v398_v49  ;;  %v437_v51 = vmax.f32 %v407_v47, 0.0 }
  0xf4   : > { %v1307_v52 = vpop.f32.mrf.mxu0 }
  0xf5   : > { %v435_v54 = vmax.f32 %v399_v50, 0.0  ;;  %v447_v58 = vpack.c.bf16 %v437_v51, %v436_v55  ;;  %v420_v62 = vadd.f32 %v1307_v52, %v1187_v16 }
  0xf6   : > { %v411_v56 = vpop.f32.mrf.mxu0 }
  0xf7   : > { %v446_v57 = vpack.c.bf16 %v435_v54, %v434_v53  ;;  %v412_v60 = vadd.f32 %v1187_v16, %v411_v56  ;;  %v440_v4 = vmax.f32 %v420_v62, 0.0  ;;  %v1221_v53 = vld [vmem:[%s1936_s4 + $0x2] ss:$0 sm:$0xff] }
  0xf8   : > { %v1308_v59 = vpop.f32.mrf.mxu0 }
  0xf9   : > { %v423_v61 = vadd.f32 %v1308_v59, %v1187_v16  ;;  %1321 = vmatprep.mubr.msk.bf16.mxu1 %vm304_vm0, %v446_v57  ;;  %v438_v2 = vmax.f32 %v412_v60, 0.0 }
  0xfa   : > { %v414_v63 = vpop.f32.mrf.mxu0  ;;  %1322 = vmatmul.mubr.msk.bf16.gmra.mxu1 %vm304_vm0, %v447_v58 }
  0xfb   : > { %v415_v0 = vadd.f32 %v1187_v16, %v414_v63  ;;  %v441_v1 = vmax.f32 %v423_v61, 0.0 }
  0xfd   : > { %v439_v3 = vmax.f32 %v415_v0, 0.0  ;;  %v449_v6 = vpack.c.bf16 %v441_v1, %v440_v4 }
  0xff   : > { %v448_v5 = vpack.c.bf16 %v439_v3, %v438_v2 }
 0x101   : > { %1325 = vmatprep.mubr.msk.bf16.mxu1 %vm304_vm0, %v448_v5 }
 0x102   : > { %1326 = vmatmul.mubr.msk.bf16.gmra.mxu1 %vm304_vm0, %v449_v6 }
 0x1aa   : > { %v1315_v9 = vpop.f32.mrf.mxu1 }
 0x1ab   : > { %v538_v17 = vadd.f32 %v1315_v9, %v1206_v12 }
 0x1ac   : > { %v529_v10 = vpop.f32.mrf.mxu1 }
 0x1ad   : > { %v530_v15 = vadd.f32 %v1206_v12, %v529_v10 }
 0x1ae   : > { %v1316_v11 = vpop.f32.mrf.mxu1 }
 0x1af   : > { %v541_v13 = vadd.f32 %v1316_v11, %v1206_v12 }
 0x1b0   : > { %v532_v14 = vpop.f32.mrf.mxu1 }
 0x1b1   : > { %v533_v16 = vadd.f32 %v1206_v12, %v532_v14  ;;  %v593_v20 = vpack.c.bf16 %v541_v13, %v538_v17 }
 0x1b2   : > { %v1319_v18 = vpop.f32.mrf.mxu1 }
 0x1b3   : > { %v592_v19 = vpack.c.bf16 %v533_v16, %v530_v15  ;;  %v554_v27 = vadd.f32 %v1319_v18, %v1206_v12 }
 0x1b4   : > { %v545_v21 = vpop.f32.mrf.mxu1 }
 0x1b5   : > { %1333 = vmatprep.mubr.msk.bf16.mxu0 %vm304_vm0, %v592_v19  ;;  %v546_v25 = vadd.f32 %v1206_v12, %v545_v21 }
 0x1b6   : > { %v1320_v22 = vpop.f32.mrf.mxu1  ;;  %1334 = vmatmul.mubr.msk.bf16.vlgmr.msra.gmra.mxu0 %vm304_vm0, %v593_v20 }
 0x1b7   : > { %v557_v23 = vadd.f32 %v1320_v22, %v1206_v12 }
 0x1b8   : > { %v548_v24 = vpop.f32.mrf.mxu1 }
 0x1b9   : > { %v549_v26 = vadd.f32 %v1206_v12, %v548_v24  ;;  %v595_v30 = vpack.c.bf16 %v557_v23, %v554_v27  ;;  %v893_v27 = vlaneseq }
 0x1ba   : > { %v1323_v28 = vpop.f32.mrf.mxu1 }
 0x1bb   : > { %v594_v29 = vpack.c.bf16 %v549_v26, %v546_v25  ;;  %v570_v37 = vadd.f32 %v1323_v28, %v1206_v12  ;;  %v1702_v28 = vand.u32 127, %v893_v27 }
 0x1bc   : > { %v561_v31 = vpop.f32.mrf.mxu1 }
 0x1bd   : > { %1337 = vmatprep.mubr.msk.bf16.mxu0 %vm304_vm0, %v594_v29  ;;  %v562_v35 = vadd.f32 %v1206_v12, %v561_v31  ;;  %v1232_v29 = vld [vmem:[%s1936_s4 + $0x3] ss:$0 sm:$0xff]  ;;  %vm895_vm1 = vcmp.lt.s32.totalorder %v1702_v28, 8 }
 0x1be   : > { %v1324_v32 = vpop.f32.mrf.mxu1  ;;  %1338 = vmatmul.mubr.msk.bf16.gmra.mxu0 %vm304_vm0, %v595_v30 }
 0x1bf   : > { %v573_v33 = vadd.f32 %v1324_v32, %v1206_v12 }
 0x1c0   : > { %v564_v34 = vpop.f32.mrf.mxu1 }
 0x1c1   : > { %v565_v36 = vadd.f32 %v1206_v12, %v564_v34  ;;  %v597_v40 = vpack.c.bf16 %v573_v33, %v570_v37 }
 0x1c2   : > { %v1327_v38 = vpop.f32.mrf.mxu1 }
 0x1c3   : > { %v596_v39 = vpack.c.bf16 %v565_v36, %v562_v35  ;;  %v586_v47 = vadd.f32 %v1327_v38, %v1206_v12 }
 0x1c4   : > { %v577_v41 = vpop.f32.mrf.mxu1 }
 0x1c5   : > { %1341 = vmatprep.mubr.msk.bf16.mxu0 %vm304_vm0, %v596_v39  ;;  %v578_v45 = vadd.f32 %v1206_v12, %v577_v41 }
 0x1c6   : > { %v1328_v42 = vpop.f32.mrf.mxu1  ;;  %1342 = vmatmul.mubr.msk.bf16.gmra.mxu0 %vm304_vm0, %v597_v40 }
 0x1c7   : > { %v589_v43 = vadd.f32 %v1328_v42, %v1206_v12 }
 0x1c8   : > { %v580_v44 = vpop.f32.mrf.mxu1 }
 0x1c9   : > { %v581_v46 = vadd.f32 %v1206_v12, %v580_v44  ;;  %v599_v49 = vpack.c.bf16 %v589_v43, %v586_v47 }
 0x1cb   : > { %v598_v48 = vpack.c.bf16 %v581_v46, %v578_v45 }
 0x1cd   : > { %1345 = vmatprep.mubr.msk.bf16.mxu0 %vm304_vm0, %v598_v48 }
 0x1ce   : > { %1346 = vmatmul.mubr.msk.bf16.gmra.mxu0 %vm304_vm0, %v599_v49 }
 0x276   : > { %v1335_v50 = vpop.f32.mrf.mxu0 }
 0x277   : > { %v689_v58 = vadd.f32 %v1335_v50, %v1221_v53 }
 0x278   : > { %v680_v51 = vpop.f32.mrf.mxu0 }
 0x279   : > { %v681_v56 = vadd.f32 %v1221_v53, %v680_v51 }
 0x27a   : > { %v1336_v52 = vpop.f32.mrf.mxu0 }
 0x27b   : > { %v692_v54 = vadd.f32 %v1336_v52, %v1221_v53 }
 0x27c   : > { %v683_v55 = vpop.f32.mrf.mxu0 }
 0x27d   : > { %v684_v57 = vadd.f32 %v1221_v53, %v683_v55  ;;  %v744_v61 = vpack.c.bf16 %v692_v54, %v689_v58 }
 0x27e   : > { %v1339_v59 = vpop.f32.mrf.mxu0 }
 0x27f   : > { %v743_v60 = vpack.c.bf16 %v684_v57, %v681_v56  ;;  %v705_v4 = vadd.f32 %v1339_v59, %v1221_v53 }
 0x280   : > { %v696_v62 = vpop.f32.mrf.mxu0 }
 0x281   : > { %1353 = vmatprep.mubr.msk.bf16.mxu1 %vm304_vm0, %v743_v60  ;;  %v697_v2 = vadd.f32 %v1221_v53, %v696_v62 }
 0x282   : > { %v1340_v63 = vpop.f32.mrf.mxu0  ;;  %1354 = vmatmul.mubr.msk.bf16.vlgmr.msra.gmra.mxu1 %vm304_vm0, %v744_v61 }
 0x283   : > { %v708_v0 = vadd.f32 %v1340_v63, %v1221_v53 }
 0x284   : > { %v699_v1 = vpop.f32.mrf.mxu0 }
 0x285   : > { %v700_v3 = vadd.f32 %v1221_v53, %v699_v1  ;;  %v746_v7 = vpack.c.bf16 %v708_v0, %v705_v4 }
 0x286   : > { %v1343_v5 = vpop.f32.mrf.mxu0 }
 0x287   : > { %v745_v6 = vpack.c.bf16 %v700_v3, %v697_v2  ;;  %v721_v14 = vadd.f32 %v1343_v5, %v1221_v53 }
 0x288   : > { %v712_v8 = vpop.f32.mrf.mxu0 }
 0x289   : > { %1357 = vmatprep.mubr.msk.bf16.mxu1 %vm304_vm0, %v745_v6  ;;  %v713_v12 = vadd.f32 %v1221_v53, %v712_v8 }
 0x28a   : > { %v1344_v9 = vpop.f32.mrf.mxu0  ;;  %1358 = vmatmul.mubr.msk.bf16.gmra.mxu1 %vm304_vm0, %v746_v7 }
 0x28b   : > { %v724_v10 = vadd.f32 %v1344_v9, %v1221_v53 }
 0x28c   : > { %v715_v11 = vpop.f32.mrf.mxu0 }
 0x28d   : > { %v716_v13 = vadd.f32 %v1221_v53, %v715_v11  ;;  %v748_v17 = vpack.c.bf16 %v724_v10, %v721_v14 }
 0x28e   : > { %v1347_v15 = vpop.f32.mrf.mxu0 }
 0x28f   : > { %v747_v16 = vpack.c.bf16 %v716_v13, %v713_v12  ;;  %v737_v24 = vadd.f32 %v1347_v15, %v1221_v53 }
 0x290   : > { %v728_v18 = vpop.f32.mrf.mxu0 }
 0x291   : > { %1361 = vmatprep.mubr.msk.bf16.mxu1 %vm304_vm0, %v747_v16  ;;  %v729_v22 = vadd.f32 %v1221_v53, %v728_v18 }
 0x292   : > { %v1348_v19 = vpop.f32.mrf.mxu0  ;;  %1362 = vmatmul.mubr.msk.bf16.gmra.mxu1 %vm304_vm0, %v748_v17 }
 0x293   : > { %v740_v20 = vadd.f32 %v1348_v19, %v1221_v53 }
 0x294   : > { %v731_v21 = vpop.f32.mrf.mxu0 }
 0x295   : > { %v732_v23 = vadd.f32 %v1221_v53, %v731_v21  ;;  %v750_v26 = vpack.c.bf16 %v740_v20, %v737_v24 }
 0x297   : > { %v749_v25 = vpack.c.bf16 %v732_v23, %v729_v22 }
 0x299   : > { %1365 = vmatprep.mubr.msk.bf16.mxu1 %vm304_vm0, %v749_v25 }
 0x29a   : > { %1366 = vmatmul.mubr.msk.bf16.gmra.mxu1 %vm304_vm0, %v750_v26 }
 0x342   : > { %v1355_v30 = vpop.f32.mrf.mxu1 }
 0x343   : > { %v839_v31 = vadd.f32 %v1355_v30, %v1232_v29 }
 0x344   : > { %v830_v32 = vpop.f32.mrf.mxu1 }
 0x345   : > { %v831_v33 = vadd.f32 %v1232_v29, %v830_v32  ;;  %v898_v34 = vsel %vm895_vm1, %v839_v31, -1e+30 }
 0x346   : > { %916 = vmax.xlane.f32.xlu1 %v898_v34  ;;  %v1356_v35 = vpop.f32.mrf.mxu1 }
 0x347   : > { %v842_v36 = vadd.f32 %v1356_v35, %v1232_v29  ;;  %v896_v37 = vsel %vm895_vm1, %v831_v33, -1e+30 }
 0x348   : > { %v833_v38 = vpop.f32.mrf.mxu1  ;;  %912 = vmax.xlane.f32.xlu0 %v896_v37 }
 0x349   : > { %v834_v39 = vadd.f32 %v1232_v29, %v833_v38  ;;  %v899_v40 = vsel %vm895_vm1, %v842_v36, -1e+30 }
 0x34a   : > { %918 = vmax.xlane.f32.xlu1 %v899_v40  ;;  %v1359_v41 = vpop.f32.mrf.mxu1 }
 0x34b   : > { %v855_v42 = vadd.f32 %v1359_v41, %v1232_v29  ;;  %v897_v43 = vsel %vm895_vm1, %v834_v39, -1e+30 }
 0x34c   : > { %v846_v44 = vpop.f32.mrf.mxu1  ;;  %914 = vmax.xlane.f32.xlu0 %v897_v43 }
 0x34d   : > { %v847_v46 = vadd.f32 %v1232_v29, %v846_v44  ;;  %v902_v48 = vsel %vm895_vm1, %v855_v42, -1e+30 }
 0x34e   : > { %v1360_v45 = vpop.f32.mrf.mxu1 }
 0x34f   : > { %v858_v47 = vadd.f32 %v1360_v45, %v1232_v29  ;;  %v900_v54 = vsel %vm895_vm1, %v847_v46, -1e+30 }
 0x350   : > { %v849_v49 = vpop.f32.mrf.mxu1  ;;  %924 = vmax.xlane.f32.xlu0 %v902_v48 }
 0x351   : > { %v850_v50 = vadd.f32 %v1232_v29, %v849_v49  ;;  %v903_v51 = vsel %vm895_vm1, %v858_v47, -1e+30 }
 0x352   : > { %926 = vmax.xlane.f32.xlu1 %v903_v51  ;;  %v1363_v52 = vpop.f32.mrf.mxu1 }
 0x353   : > { %v871_v53 = vadd.f32 %v1363_v52, %v1232_v29  ;;  %v901_v56 = vsel %vm895_vm1, %v850_v50, -1e+30 }
 0x354   : > { %v862_v55 = vpop.f32.mrf.mxu1  ;;  %920 = vmax.xlane.f32.xlu0 %v900_v54 }
 0x355   : > { %v863_v58 = vadd.f32 %v1232_v29, %v862_v55  ;;  %v906_v60 = vsel %vm895_vm1, %v871_v53, -1e+30 }
 0x356   : > { %v1364_v57 = vpop.f32.mrf.mxu1  ;;  %922 = vmax.xlane.f32.xlu1 %v901_v56 }
 0x357   : > { %v874_v59 = vadd.f32 %v1364_v57, %v1232_v29  ;;  %v1730_v1 = vsel %vm895_vm1, %v863_v58, -1e+30 }
 0x358   : > { %v865_v61 = vpop.f32.mrf.mxu1  ;;  %932 = vmax.xlane.f32.xlu0 %v906_v60 }
 0x359   : > { %v866_v62 = vadd.f32 %v1232_v29, %v865_v61  ;;  %v907_v63 = vsel %vm895_vm1, %v874_v59, -1e+30 }
 0x35a   : > { %v1367_v0 = vpop.f32.mrf.mxu1  ;;  %934 = vmax.xlane.f32.xlu1 %v907_v63 }
 0x35b   : > { %v1735_v4 = vsel %vm895_vm1, %v866_v62, -1e+30  ;;  %v887_v6 = vadd.f32 %v1367_v0, %v1232_v29 }
 0x35c   : > { %v878_v2 = vpop.f32.mrf.mxu1  ;;  %928 = vmax.xlane.f32.xlu0 %v1730_v1 }
 0x35d   : > { %v879_v3 = vadd.f32 %v1232_v29, %v878_v2  ;;  %v1749_v12 = vsel %vm895_vm1, %v887_v6, -1e+30 }
 0x35e   : > { %v1368_v5 = vpop.f32.mrf.mxu1  ;;  %930 = vmax.xlane.f32.xlu1 %v1735_v4 }
 0x35f   : > { %v1740_v7 = vsel %vm895_vm1, %v879_v3, -1e+30  ;;  %v890_v10 = vadd.f32 %v1368_v5, %v1232_v29 }
 0x360   : > { %v881_v8 = vpop.f32.mrf.mxu1  ;;  %936 = vmax.xlane.f32.xlu0 %v1740_v7 }
 0x361   : > { %v882_v9 = vadd.f32 %v1232_v29, %v881_v8  ;;  %v1755_v13 = vsel %vm895_vm1, %v890_v10, -1e+30 }
 0x363   : > { %v1745_v11 = vsel %vm895_vm1, %v882_v9, -1e+30 }
 0x364   : > { %938 = vmax.xlane.f32.xlu1 %v1745_v11  ;;  %940 = vmax.xlane.f32.xlu0 %v1749_v12 }
 0x368   : > { %942 = vmax.xlane.f32.xlu1 %v1755_v13 }
 0x3cf   : > { %v917_v14 = vpop.xlane.xlu1 %916 }
 0x3d0   : > { %v1758_v15 = vsub.f32 %v898_v34, %v917_v14 }
 0x3d1   : > { %v913_v16 = vpop.xlane.xlu0 %912 }
 0x3d2   : > { %v964_v17 = vmul.f32 1.442695, %v1758_v15  ;;  %v1761_v18 = vsub.f32 %v896_v37, %v913_v16 }
 0x3d3   : > { %v919_v19 = vpop.xlane.xlu1 %918 }
 0x3d4   : > { %1426 = vpow2.f32 %v964_v17  ;;  %v960_v20 = vmul.f32 1.442695, %v1761_v18  ;;  %v1764_v21 = vsub.f32 %v899_v40, %v919_v19 }
 0x3d5   : > { %v915_v22 = vpop.xlane.xlu0 %914 }
 0x3d6   : > { %1428 = vpow2.f32 %v960_v20  ;;  %v966_v23 = vmul.f32 1.442695, %v1764_v21  ;;  %v1767_v24 = vsub.f32 %v897_v43, %v915_v22 }
 0x3d8   : > { %1430 = vpow2.f32 %v966_v23  ;;  %v962_v25 = vmul.f32 1.442695, %v1767_v24 }
 0x3d9   : > { %v925_v26 = vpop.xlane.xlu0 %924 }
 0x3da   : > { %1432 = vpow2.f32 %v962_v25  ;;  %v1770_v27 = vsub.f32 %v902_v48, %v925_v26 }
 0x3db   : > { %v927_v29 = vpop.xlane.xlu1 %926 }
 0x3dc   : > { %v972_v30 = vmul.f32 1.442695, %v1770_v27  ;;  %v1773_v31 = vsub.f32 %v903_v51, %v927_v29 }
 0x3dd   : > { %v921_v32 = vpop.xlane.xlu0 %920 }
 0x3de   : > { %1434 = vpow2.f32 %v972_v30  ;;  %v974_v33 = vmul.f32 1.442695, %v1773_v31  ;;  %v1776_v34 = vsub.f32 %v900_v54, %v921_v32 }
 0x3df   : > { %v923_v35 = vpop.xlane.xlu1 %922 }
 0x3e0   : > { %1436 = vpow2.f32 %v974_v33  ;;  %v968_v36 = vmul.f32 1.442695, %v1776_v34  ;;  %v1779_v37 = vsub.f32 %v901_v56, %v923_v35 }
 0x3e1   : > { %v1427_v38 = vpop.eup %1426  ;;  %v933_v39 = vpop.xlane.xlu0 %932 }
 0x3e2   : > { %1438 = vpow2.f32 %v968_v36  ;;  %v970_v40 = vmul.f32 1.442695, %v1779_v37  ;;  %v1782_v41 = vsub.f32 %v906_v60, %v933_v39  ;;  %v994_v42 = vsel %vm895_vm1, %v1427_v38, 0.0 }
 0x3e3   : > { %v1429_v43 = vpop.eup %1428  ;;  %v935_v44 = vpop.xlane.xlu1 %934  ;;  %1012 = vadd.xlane.f32.xlu0 %v994_v42 }
 0x3e4   : > { %1440 = vpow2.f32 %v970_v40  ;;  %v980_v45 = vmul.f32 1.442695, %v1782_v41  ;;  %v1787_v46 = vsub.f32 %v907_v63, %v935_v44  ;;  %v992_v49 = vsel %vm895_vm1, %v1429_v43, 0.0 }
 0x3e5   : > { %v1431_v47 = vpop.eup %1430  ;;  %v929_v48 = vpop.xlane.xlu0 %928 }
 0x3e6   : > { %1442 = vpow2.f32 %v980_v45  ;;  %v982_v50 = vmul.f32 1.442695, %v1787_v46  ;;  %v1793_v51 = vsub.f32 %v1730_v1, %v929_v48  ;;  %v995_v52 = vsel %vm895_vm1, %v1431_v47, 0.0 }
 0x3e7   : > { %v1433_v53 = vpop.eup %1432  ;;  %1014 = vadd.xlane.f32.xlu1 %v995_v52  ;;  %v931_v54 = vpop.xlane.xlu1 %930  ;;  %1008 = vadd.xlane.f32.xlu0 %v992_v49 }
 0x3e8   : > { %1444 = vpow2.f32 %v982_v50  ;;  %v976_v55 = vmul.f32 1.442695, %v1793_v51  ;;  %v1799_v56 = vsub.f32 %v1735_v4, %v931_v54  ;;  %v993_v60 = vsel %vm895_vm1, %v1433_v53, 0.0 }
 0x3e9   : > { %v937_v57 = vpop.xlane.xlu0 %936 }
 0x3ea   : > { %1446 = vpow2.f32 %v976_v55  ;;  %v978_v58 = vmul.f32 1.442695, %v1799_v56  ;;  %v1803_v59 = vsub.f32 %v1740_v7, %v937_v57 }
 0x3eb   : > { %v1435_v61 = vpop.eup %1434  ;;  %1010 = vadd.xlane.f32.xlu1 %v993_v60 }
 0x3ec   : > { %1448 = vpow2.f32 %v978_v58  ;;  %v984_v62 = vmul.f32 1.442695, %v1803_v59  ;;  %v998_v63 = vsel %vm895_vm1, %v1435_v61, 0.0 }
 0x3ed   : > { %v1437_v0 = vpop.eup %1436  ;;  %v939_v1 = vpop.xlane.xlu1 %938  ;;  %1020 = vadd.xlane.f32.xlu0 %v998_v63 }
 0x3ee   : > { %v941_v2 = vpop.xlane.xlu0 %940  ;;  %1450 = vpow2.f32 %v984_v62  ;;  %v1811_v3 = vsub.f32 %v1745_v11, %v939_v1  ;;  %v999_v5 = vsel %vm895_vm1, %v1437_v0, 0.0 }
 0x3ef   : > { %v1814_v4 = vsub.f32 %v1749_v12, %v941_v2  ;;  %v1439_v6 = vpop.eup %1438  ;;  %1022 = vadd.xlane.f32.xlu1 %v999_v5 }
 0x3f0   : > { %v986_v7 = vmul.f32 1.442695, %v1811_v3  ;;  %v996_v9 = vsel %vm895_vm1, %v1439_v6, 0.0 }
 0x3f1   : > { %v988_v8 = vmul.f32 1.442695, %v1814_v4  ;;  %v1441_v10 = vpop.eup %1440  ;;  %v943_v14 = vpop.xlane.xlu1 %942  ;;  %1016 = vadd.xlane.f32.xlu0 %v996_v9 }
 0x3f2   : > { %1452 = vpow2.f32 %v986_v7  ;;  %v1823_v11 = vsub.f32 %v1755_v13, %v943_v14  ;;  %v997_v12 = vsel %vm895_vm1, %v1441_v10, 0.0 }
 0x3f3   : > { %v1443_v16 = vpop.eup %1442  ;;  %1454 = vpow2.f32 %v988_v8  ;;  %1018 = vadd.xlane.f32.xlu1 %v997_v12 }
 0x3f4   : > { %v990_v17 = vmul.f32 1.442695, %v1823_v11  ;;  %v1002_v19 = vsel %vm895_vm1, %v1443_v16, 0.0 }
 0x3f5   : > { %v1445_v20 = vpop.eup %1444  ;;  %1028 = vadd.xlane.f32.xlu0 %v1002_v19 }
 0x3f6   : > { %1456 = vpow2.f32 %v990_v17  ;;  %v1003_v22 = vsel %vm895_vm1, %v1445_v20, 0.0 }
 0x3f7   : > { %v1447_v23 = vpop.eup %1446  ;;  %1030 = vadd.xlane.f32.xlu1 %v1003_v22 }
 0x3f8   : > { %v1000_v13 = vsel %vm895_vm1, %v1447_v23, 0.0 }
 0x3f9   : > { %v1449_v25 = vpop.eup %1448  ;;  %1024 = vadd.xlane.f32.xlu0 %v1000_v13 }
 0x3fa   : > { %v1001_v26 = vsel %vm895_vm1, %v1449_v25, 0.0 }
 0x3fb   : > { %v1451_v29 = vpop.eup %1450  ;;  %1026 = vadd.xlane.f32.xlu1 %v1001_v26 }
 0x3fc   : > { %v1004_v30 = vsel %vm895_vm1, %v1451_v29, 0.0 }
 0x3fd   : > { %1032 = vadd.xlane.f32.xlu0 %v1004_v30 }
 0x3ff   : > { %v1453_v32 = vpop.eup %1452 }
 0x400   : > { %v1455_v33 = vpop.eup %1454  ;;  %v1005_v35 = vsel %vm895_vm1, %v1453_v32, 0.0 }
 0x401   : > { %1034 = vadd.xlane.f32.xlu1 %v1005_v35  ;;  %v1006_v36 = vsel %vm895_vm1, %v1455_v33, 0.0 }
 0x402   : > { %1036 = vadd.xlane.f32.xlu0 %v1006_v36 }
 0x403   : > { %v1457_v38 = vpop.eup %1456 }
 0x404   : > { %v1007_v39 = vsel %vm895_vm1, %v1457_v38, 0.0 }
 0x405   : > { %1038 = vadd.xlane.f32.xlu1 %v1007_v39 }
 0x46c   : > { %v1013_v40 = vpop.xlane.xlu0 %1012 }
 0x46d   : > { %1458 = vlog2.f32 %v1013_v40 }
 0x470   : > { %v1015_v42 = vpop.xlane.xlu1 %1014  ;;  %v1009_v43 = vpop.xlane.xlu0 %1008 }
 0x471   : > { %1460 = vlog2.f32 %v1015_v42 }
 0x472   : > { %1462 = vlog2.f32 %v1009_v43 }
 0x474   : > { %v1011_v44 = vpop.xlane.xlu1 %1010 }
 0x475   : > { %1464 = vlog2.f32 %v1011_v44 }
 0x476   : > { %v1021_v45 = vpop.xlane.xlu0 %1020 }
 0x477   : > { %1466 = vlog2.f32 %v1021_v45 }
 0x478   : > { %v1023_v47 = vpop.xlane.xlu1 %1022 }
 0x479   : > { %1468 = vlog2.f32 %v1023_v47 }
 0x47a   : > { %v1459_v48 = vpop.eup %1458  ;;  %v1017_v49 = vpop.xlane.xlu0 %1016 }
 0x47b   : > { %v1045_v28 = vmul.f32 0.6931472, %v1459_v48  ;;  %1470 = vlog2.f32 %v1017_v49 }
 0x47c   : > { %v1019_v50 = vpop.xlane.xlu1 %1018 }
 0x47d   : > { %v1074_v52 = vsub.f32 %v1758_v15, %v1045_v28  ;;  %1472 = vlog2.f32 %v1019_v50 }
 0x47e   : > { %v1461_v53 = vpop.eup %1460  ;;  %v1029_v54 = vpop.xlane.xlu0 %1028 }
 0x47f   : > { %v1463_v55 = vpop.eup %1462  ;;  %1090 = vst [vmem:[%s1848_s26 + $0x10] sm:$0xff] %v1074_v52  ;;  %v1047_v57 = vmul.f32 0.6931472, %v1461_v53  ;;  %1474 = vlog2.f32 %v1029_v54 }
 0x480   : > { %v1041_v58 = vmul.f32 0.6931472, %v1463_v55  ;;  %v1031_v60 = vpop.xlane.xlu1 %1030 }
 0x481   : > { %v1075_v61 = vsub.f32 %v1764_v21, %v1047_v57  ;;  %1476 = vlog2.f32 %v1031_v60 }
 0x482   : > { %v1465_v62 = vpop.eup %1464  ;;  %v1072_v15 = vsub.f32 %v1761_v18, %v1041_v58  ;;  %v1025_v63 = vpop.xlane.xlu0 %1024 }
 0x483   : > { %1091 = vst [vmem:[%s1848_s26 + $0x18] sm:$0xff] %v1075_v61  ;;  %v1043_v0 = vmul.f32 0.6931472, %v1465_v62  ;;  %1478 = vlog2.f32 %v1025_v63 }
 0x484   : > { %v1467_v1 = vpop.eup %1466  ;;  %1088 = vst [vmem:[%s1848_s26] sm:$0xff] %v1072_v15  ;;  %v1027_v2 = vpop.xlane.xlu1 %1026 }
 0x485   : > { %v1073_v5 = vsub.f32 %v1767_v24, %v1043_v0  ;;  %v1053_v6 = vmul.f32 0.6931472, %v1467_v1  ;;  %1480 = vlog2.f32 %v1027_v2 }
 0x486   : > { %v1469_v7 = vpop.eup %1468  ;;  %v1033_v21 = vpop.xlane.xlu0 %1032 }
 0x487   : > { %1089 = vst [vmem:[%s1848_s26 + $0x8] sm:$0xff] %v1073_v5  ;;  %v1078_v8 = vsub.f32 %v1770_v27, %v1053_v6  ;;  %v1055_v18 = vmul.f32 0.6931472, %v1469_v7  ;;  %1482 = vlog2.f32 %v1033_v21 }
 0x488   : > { %v1471_v9 = vpop.eup %1470 }
 0x489   : > { %1094 = vst [vmem:[%s1848_s26 + $0x30] sm:$0xff] %v1078_v8  ;;  %v1079_v10 = vsub.f32 %v1773_v31, %v1055_v18  ;;  %v1049_v14 = vmul.f32 0.6931472, %v1471_v9 }
 0x48a   : > { %v1473_v12 = vpop.eup %1472  ;;  %v1035_v16 = vpop.xlane.xlu1 %1034 }
 0x48b   : > { %1095 = vst [vmem:[%s1848_s26 + $0x38] sm:$0xff] %v1079_v10  ;;  %v1076_v24 = vsub.f32 %v1776_v34, %v1049_v14  ;;  %v1051_v17 = vmul.f32 0.6931472, %v1473_v12  ;;  %1484 = vlog2.f32 %v1035_v16  ;;  %v1037_v19 = vpop.xlane.xlu0 %1036 }
 0x48c   : > { %v1475_v20 = vpop.eup %1474  ;;  %1486 = vlog2.f32 %v1037_v19 }
 0x48d   : > { %1092 = vst [vmem:[%s1848_s26 + $0x20] sm:$0xff] %v1076_v24  ;;  %v1077_v27 = vsub.f32 %v1779_v37, %v1051_v17  ;;  %v1061_v22 = vmul.f32 0.6931472, %v1475_v20 }
 0x48e   : > { %v1477_v31 = vpop.eup %1476  ;;  %v1039_v23 = vpop.xlane.xlu1 %1038 }
 0x48f   : > { %1093 = vst [vmem:[%s1848_s26 + $0x28] sm:$0xff] %v1077_v27  ;;  %v1082_v13 = vsub.f32 %v1782_v41, %v1061_v22  ;;  %v1063_v25 = vmul.f32 0.6931472, %v1477_v31  ;;  %1488 = vlog2.f32 %v1039_v23 }
 0x490   : > { %v1479_v34 = vpop.eup %1478 }
 0x491   : > { %1098 = vst [vmem:[%s1848_s26 + $0x50] sm:$0xff] %v1082_v13  ;;  %v1083_v26 = vsub.f32 %v1787_v46, %v1063_v25  ;;  %v1057_v29 = vmul.f32 0.6931472, %v1479_v34 }
 0x492   : > { %v1481_v30 = vpop.eup %1480 }
 0x493   : > { %1099 = vst [vmem:[%s1848_s26 + $0x58] sm:$0xff] %v1083_v26  ;;  %v1080_v37 = vsub.f32 %v1793_v51, %v1057_v29  ;;  %v1059_v32 = vmul.f32 0.6931472, %v1481_v30 }
 0x494   : > { %v1483_v33 = vpop.eup %1482 }
 0x495   : > { %1096 = vst [vmem:[%s1848_s26 + $0x40] sm:$0xff] %v1080_v37  ;;  %v1081_v41 = vsub.f32 %v1799_v56, %v1059_v32  ;;  %v1065_v35 = vmul.f32 0.6931472, %v1483_v33 }
 0x497   : > { %1097 = vst [vmem:[%s1848_s26 + $0x48] sm:$0xff] %v1081_v41  ;;  %v1084_v36 = vsub.f32 %v1803_v59, %v1065_v35 }
 0x498   : > { %v1485_v38 = vpop.eup %1484 }
 0x499   : > { %v1487_v46 = vpop.eup %1486  ;;  %1100 = vst [vmem:[%s1848_s26 + $0x60] sm:$0xff] %v1084_v36  ;;  %v1067_v39 = vmul.f32 0.6931472, %v1485_v38 }
 0x49a   : > { %v1069_v40 = vmul.f32 0.6931472, %v1487_v46 }
 0x49b   : > { %v1085_v51 = vsub.f32 %v1811_v3, %v1067_v39 }
 0x49c   : > { %v1489_v42 = vpop.eup %1488  ;;  %v1086_v56 = vsub.f32 %v1814_v4, %v1069_v40 }
 0x49d   : > { %1101 = vst [vmem:[%s1848_s26 + $0x68] sm:$0xff] %v1085_v51  ;;  %v1071_v43 = vmul.f32 0.6931472, %v1489_v42 }
 0x49e   : > { %1102 = vst [vmem:[%s1848_s26 + $0x70] sm:$0xff] %v1086_v56 }
 0x49f   : > { %v1087_v59 = vsub.f32 %v1823_v11, %v1071_v43 }
 0x4a1   : > { %1103 = vst [vmem:[%s1848_s26 + $0x78] sm:$0xff] %v1087_v59 }
 0x4a2   : > { %1503 = shalt.err (!%p1500_p3)
}
 0x4a3   : > { %s1504_s14 = scalar_lea.hbm %s1884_s9, 2048  ;;  %s1508_s17 = scalar_lea.hbm %s1937_s5, 4096 }
 0x4a4   : > { %p1505_p4 = scmp.ne.s32.totalorder %s1884_s9, %s1504_s14  ;;  %p1509_p9 = scmp.lt.s32.totalorder %s1884_s9, %s1937_s5 }
 0x4a5   : > { %p1510_p10 = scmp.lt.s32.totalorder %s1508_s17, %s1504_s14 }
 0x4a6   : > { %p1506_p7 = pnand %p1505_p4, %p1623_p5 }
 0x4a7   : > { %p1511_p11 = por %p1510_p10, %p1509_p9 }
 0x4a8   : > { %p1507_p8 = pneg %p1506_p7 }
 0x4aa   : > { %p1512_p12 = pnand %p1511_p11, %p1507_p8 }
 0x4ac   : > { %1515 = shalt.err (!%p1512_p12)
}
 0x4ad   : > { %s1553_s26 = smov 128   ;;  %s1554_s30 = smov 8  }
 0x4ae   : > { %1369 = dma.vmem_to_hbm [thread:$0]  (%p1623_p5), %s1886_s6, 2048, %s1884_s9, %s1892_s22, %s1553_s26, %s1553_s26, %s1554_s30  }
 0x4af PF: > { %p1375_p13 = scmp.ge.s32.totalorder %s1550_s21, 2  ;;  %s1133_s7 = sand.u32 1, %s1538_s18  }
 0x4b0   : > { %s1134_s8 = scalar_lea.sflag [#allocation3], %s1133_s7 }
 0x4b1   : > { %p1372_p0 = pnand %p1375_p13, %p1627_p6 }
 0x4b3   : > { %p1373_p1 = pneg %p1372_p0 }
 0x4b5   : > { %1533 = dma.done.wait (%p1373_p1), %s1134_s8, 2048  }
 0x4b6   : > { %1535 = vsyncadd (%p1373_p1), %s1134_s8, 4294965248  ;;  %p15_p2 = scmp.ge.s32.totalorder %s1610_s24, 4   ;;  %s1940_s18 = smov %s1542_s19 }
 0x4b7   : > { %s1941_s19 = smov %s1546_s20  ;;  %s1942_s20 = smov %s1621_s27 }
 0x4b8   : > { %s1943_s21 = smov %s1610_s24  ;;  %17 = sbr.rel (!%p15_p2) target bundleno = 3 (0x3), region = 76 }
 0x4bd   :  { %1139 = vsyncpa [#allocation3], 1 }
 0x4be   :  { %1141 = vsyncpa [#allocation3 + $0x1], 1 }

</bundles_post_ra>
